<compile_context>
chip_gen: v6e
topology: v6e:2x2x1
jax: 0.10.0
libtpu: 0.0.40
codegen_flags: <defaults>
</compile_context>

<pallas_src>
import math

import jax
import jax.numpy as jnp
from jax.experimental import pallas as pl
from jax.experimental.pallas import tpu as pltpu


def ridge_kernel(x_ref, w_ref, o_ref, acc_ref):
    # x_ref: (TB, TF) tile, w_ref: (1, TF), o_ref: (TB, 1), acc_ref: (TB, 1) f32.
    k = pl.program_id(1)

    @pl.when(k == 0)
    def _():
        acc_ref[...] = jnp.zeros_like(acc_ref)

    # VPU multiply + lane (XLU) reduce; w broadcasts over sublanes for free.
    x = x_ref[...].astype(jnp.float32)
    w = w_ref[...].astype(jnp.float32)
    acc_ref[...] += jnp.sum(x * w, axis=-1, keepdims=True)

    @pl.when(k == pl.num_programs(1) - 1)
    def _():
        o_ref[...] = acc_ref[...].astype(o_ref.dtype)


def _pick_tiles(B, F, dtype_bytes=4, target_bytes=2 << 20):
    """Choose (TB, TF) so one x tile is ~2 MiB and tiling rules are respected."""
    # Feature tile: keep full F unless it's very wide AND cleanly divisible by
    # a 128-multiple (so padded-garbage never leaks into the accumulator).
    TF = F
    if F > 8192:
        for cand in (4096, 2048, 1024, 512, 256, 128):
            if F % cand == 0:
                TF = cand
                break
    # Batch tile: aim for ~target_bytes per x block, rows a multiple of 8
    # (required whenever TB != B); Pallas pads / drops the tail block.
    rows = max(8, (target_bytes // max(TF * dtype_bytes, 1)) // 8 * 8)
    if B <= rows:
        TB = B                      # full dim -> always legal
    else:
        TB = max(8, (rows // 8) * 8)
    return TB, TF


def ridge_regression(x, w):
    """Forward of RidgeRegression: x (B, F), w (1, F) -> (B, 1)."""
    B, F = x.shape
    assert w.shape == (1, F)

    TB, TF = _pick_tiles(B, F, dtype_bytes=x.dtype.itemsize)
    n_b = pl.cdiv(B, TB)
    n_f = pl.cdiv(F, TF)

    cost = pl.CostEstimate(
        flops=2 * B * F,
        transcendentals=0,
        bytes_accessed=B * F * x.dtype.itemsize
        + F * w.dtype.itemsize
        + B * x.dtype.itemsize,
    )

    return pl.pallas_call(
        ridge_kernel,
        out_shape=jax.ShapeDtypeStruct((B, 1), x.dtype),
        grid_spec=pltpu.PrefetchScalarGridSpec(
            num_scalar_prefetch=0,
            grid=(n_b, n_f),
            in_specs=[
                pl.BlockSpec((TB, TF), lambda i, k: (i, k)),
                pl.BlockSpec((1, TF), lambda i, k: (0, k)),
            ],
            out_specs=pl.BlockSpec((TB, 1), lambda i, k: (i, 0)),
            scratch_shapes=[pltpu.VMEM((TB, 1), jnp.float32)],
        ),
        compiler_params=pltpu.CompilerParams(
            dimension_semantics=("parallel", "arbitrary"),
        ),
        cost_estimate=cost,
    )(x, w)


if __name__ == "__main__":
    key = jax.random.PRNGKey(0)
    kx, kw = jax.random.split(key)

    batch = 8
    n_features = 32

    x = jax.random.normal(kx, (batch, n_features), dtype=jnp.float32)

    # Deterministic init mirroring torch.nn.Linear default:
    # uniform(-1/sqrt(fan_in), 1/sqrt(fan_in)), weight shape (1, n_features).
    bound = 1.0 / math.sqrt(n_features)
    w = jax.random.uniform(
        kw, (1, n_features), dtype=jnp.float32, minval=-bound, maxval=bound
    )

    out = ridge_regression(x, w)
    out = jax.block_until_ready(out)

    # Sanity check against plain JAX reference.
    ref = x @ w.T
    assert out.shape == (batch, 1)
    assert jnp.allclose(out, ref, atol=1e-5, rtol=1e-5)

    print("KERNEL_OK")
</pallas_src>

<mosaic_0001>
module attributes {stable_mosaic.version = 11 : i64} {
  func.func @ridge_kernel(%arg0: i32, %arg1: i32, %arg2: memref<8x32xf32, #tpu.memory_space<vmem>>, %arg3: memref<1x32xf32, #tpu.memory_space<vmem>>, %arg4: memref<8x1xf32, #tpu.memory_space<vmem>>, %arg5: memref<8x1xf32, #tpu.memory_space<vmem>>) attributes {dimension_semantics = [#tpu.dimension_semantics<parallel>, #tpu.dimension_semantics<arbitrary>], iteration_bounds = array<i64: 1, 1>, scalar_prefetch = 0 : i64, scratch_operands = 1 : i64, tpu.core_type = #tpu.core_type<tc>, window_params = [{transform_indices = @transform_0, window_bounds = array<i64: 8, 32>}, {transform_indices = @transform_1, window_bounds = array<i64: 1, 32>}, {transform_indices = @transform_2, window_bounds = array<i64: 8, 1>}]} {
    %c0_i32 = arith.constant 0 : i32
    %0 = arith.cmpi eq, %arg1, %c0_i32 : i32
    %1 = arith.extui %0 : i1 to i32
    %c0_i32_0 = arith.constant 0 : i32
    %2 = arith.cmpi ne, %1, %c0_i32_0 : i32
    scf.if %2 {
      %cst_10 = arith.constant 0.000000e+00 : f32
      %15 = vector.broadcast %cst_10 : f32 to vector<8x1xf32>
      %c0_11 = arith.constant 0 : index
      %c0_12 = arith.constant 0 : index
      %16 = vector.load %arg5[%c0_11, %c0_12] : memref<8x1xf32, #tpu.memory_space<vmem>>, vector<8x1xf32>
      tpu.vector_store %arg5[%c0_11, %c0_12], %15 {strides = array<i32>} : memref<8x1xf32, #tpu.memory_space<vmem>>, vector<8x1xf32>,
    } else {
    }
    %c0 = arith.constant 0 : index
    %c0_1 = arith.constant 0 : index
    %3 = vector.load %arg2[%c0, %c0_1] : memref<8x32xf32, #tpu.memory_space<vmem>>, vector<8x32xf32>
    %c0_2 = arith.constant 0 : index
    %c0_3 = arith.constant 0 : index
    %4 = vector.load %arg3[%c0_2, %c0_3] : memref<1x32xf32, #tpu.memory_space<vmem>>, vector<1x32xf32>
    %c0_4 = arith.constant 0 : index
    %c0_5 = arith.constant 0 : index
    %5 = vector.load %arg5[%c0_4, %c0_5] : memref<8x1xf32, #tpu.memory_space<vmem>>, vector<8x1xf32>
    %6 = vector.broadcast %4 : vector<1x32xf32> to vector<8x32xf32>
    %7 = arith.mulf %3, %6 : vector<8x32xf32>
    %cst = arith.constant dense<0.000000e+00> : vector<8xf32>
    %8 = vector.multi_reduction <add>, %7, %cst [1] : vector<8x32xf32> to vector<8xf32>
    %9 = vector.shape_cast %8 : vector<8xf32> to vector<8x1xf32>
    %10 = arith.addf %5, %9 : vector<8x1xf32>
    %c0_6 = arith.constant 0 : index
    %c0_7 = arith.constant 0 : index
    %11 = vector.load %arg5[%c0_6, %c0_7] : memref<8x1xf32, #tpu.memory_space<vmem>>, vector<8x1xf32>
    tpu.vector_store %arg5[%c0_6, %c0_7], %10 {strides = array<i32>} : memref<8x1xf32, #tpu.memory_space<vmem>>, vector<8x1xf32>,
    %c0_i32_8 = arith.constant 0 : i32
    %12 = arith.cmpi eq, %arg1, %c0_i32_8 : i32
    %13 = arith.extui %12 : i1 to i32
    %c0_i32_9 = arith.constant 0 : i32
    %14 = arith.cmpi ne, %13, %c0_i32_9 : i32
    scf.if %14 {
      %c0_10 = arith.constant 0 : index
      %c0_11 = arith.constant 0 : index
      %15 = vector.load %arg5[%c0_10, %c0_11] : memref<8x1xf32, #tpu.memory_space<vmem>>, vector<8x1xf32>
      %c0_12 = arith.constant 0 : index
      %c0_13 = arith.constant 0 : index
      %16 = vector.load %arg4[%c0_12, %c0_13] : memref<8x1xf32, #tpu.memory_space<vmem>>, vector<8x1xf32>
      tpu.vector_store %arg4[%c0_12, %c0_13], %15 {strides = array<i32>} : memref<8x1xf32, #tpu.memory_space<vmem>>, vector<8x1xf32>,
    } else {
    }
    return
  }
  func.func @transform_0(%arg0: i32, %arg1: i32) -> (i32, i32) {
    %c0_i32 = arith.constant 0 : i32
    return %arg0, %arg1 : i32, i32
  }
  func.func @transform_1(%arg0: i32, %arg1: i32) -> (i32, i32) {
    %c0_i32 = arith.constant 0 : i32
    %c0_i32_0 = arith.constant 0 : i32
    return %c0_i32, %arg1 : i32, i32
  }
  func.func @transform_2(%arg0: i32, %arg1: i32) -> (i32, i32) {
    %c0_i32 = arith.constant 0 : i32
    %c0_i32_0 = arith.constant 0 : i32
    return %arg0, %c0_i32 : i32, i32
  }
}

</mosaic_0001>

<bundles_post_ra>
// kernel: tpu_custom_call.1
= control target key start
LH: loop header
LB: loop body
LE: loop exit
PB: predicated region body
PF: predicated region fallthrough
CT: control target
= control target key end

     0   :  { %7 = vsyncpa [#allocation4], 0  ;;  %s81_s9 = smov [#allocation3]   ;;  %s107_s0 = inlined_call_operand.hbm [shape: f32[8,32], index: 0, kind: input, shape index: {}]   ;;  %s108_s1 = inlined_call_operand.vmem [shape: f32[1,32], index: 1, kind: input, shape index: {}]   ;;  %s109_s2 = inlined_call_operand.vmem [shape: f32[8,1], index: 2, kind: output, shape index: {}]  }
   0x1   :  { %s14_s10 = sshll.u32 %s81_s9, 4  ;;  %s15_s10 = int_to_ptr.vmem [resolvable:$true] %s14_s10 }
   0x2   :  { %s67_s11 = scalar_lea.vmem %s15_s10, 128  ;;  %p72_p1 = scmp.lt.s32.totalorder %s15_s10, %s15_s10 }
   0x3   :  { %p68_p0 = scmp.ne.s32.totalorder %s15_s10, %s67_s11  ;;  %p73_p2 = scmp.lt.s32.totalorder %s67_s11, %s67_s11 }
   0x5   :  { %p74_p3 = por %p73_p2, %p72_p1 }
   0x7   :  { %p75_p4 = pnand %p74_p3, %p68_p0 }
   0x9   :  { %78 = shalt.err (!%p75_p4)
}
   0xa   :  { %17 = dma.hbm_to_vmem [thread:$0]  %s107_s0, 128, %s15_s10, [#allocation4]  }
   0xb   :  { %79 = dma.done.wait [#allocation4], 128  }
   0xc   :  { %80 = vsyncadd [#allocation4], 4294967168  ;;  %vm27_vm0 = vcmask 7168   ;;  %v82_v0 = vmov 0.0   ;;  %v29_v1 = vld [vmem:[#allocation3] sm:$0xff]  ;;  %vm39_vm1 = vcmask 261120  }
   0xd   :  { %28 = vst.msk [vmem:[#allocation2] sm:$0xff] %vm27_vm0, %v82_v0  ;;  %v56_v2 = vld [vmem:[%s108_s1] ss:$0 sm:$0xff] }
   0xe   :  { %v38_v3 = vmul.f32 %v56_v2, %v29_v1 }
  0x10   :  { %v40_v4 = vsel %vm39_vm1, %v38_v3, 0.0 }
  0x11   :  { %41 = vadd.xlane.f32.xlu0 %v40_v4 }
  0x14   :  { %v31_v5 = vld [vmem:[#allocation2] sm:$0xff] }
  0x9a   :  { %v42_v6 = vpop.xlane.xlu0 %41 }
  0x9b   :  { %v43_v7 = vadd.f32 %v42_v6, %v31_v5 }
  0x9d   :  { %45 = vst.msk [vmem:[#allocation2] sm:$0xff] %vm27_vm0, %v43_v7 }
  0xa4   :  { %v49_v8 = vld [vmem:[#allocation2] sm:$0xff] }
  0xa5   :  { %50 = vst.msk [vmem:[%s109_s2] sm:$0xff] %vm27_vm0, %v49_v8 }
  0xa6   :  { %55 = vsyncpa [#allocation4], 1 }

</bundles_post_ra>
